<compile_context>
chip_gen: v6e
topology: v6e:2x2x1
jax: 0.10.0
libtpu: 0.0.40
codegen_flags: <defaults>
</compile_context>

<pallas_src>
import functools
import math

import jax
import jax.numpy as jnp
from jax.experimental import pallas as pl
from jax.experimental.pallas import tpu as pltpu


_VMEM_LIMIT = 48 * 1024 * 1024  # above the 32 MiB scoped default, below v7x physical


# ----------------------------------------------------------------------------
# Block-size helpers
# ----------------------------------------------------------------------------

def _pick_block(dim, preferred, align):
    """Largest multiple-of-`align` divisor of dim that is <= preferred.

    Falls back to the full dim (single block) when dim is small or has no
    aligned divisor (correct, just less tiled).
    """
    if dim <= preferred:
        return dim
    b = (preferred // align) * align
    while b >= align:
        if dim % b == 0:
            return b
        b -= align
    return dim


# ----------------------------------------------------------------------------
# Multi-output tiled linear:  y_i = x @ W_i + b_i   (shared x read, f32 acc)
# ----------------------------------------------------------------------------

def _multi_linear_kernel(*refs, n_out):
    x_ref = refs[0]
    w_refs = refs[1:1 + n_out]
    b_refs = refs[1 + n_out:1 + 2 * n_out]
    o_refs = refs[1 + 2 * n_out:1 + 3 * n_out]
    acc_refs = refs[1 + 3 * n_out:1 + 4 * n_out]

    k = pl.program_id(2)

    @pl.when(k == 0)
    def _():
        for acc in acc_refs:
            acc[...] = jnp.zeros_like(acc)

    x = x_ref[...].astype(jnp.bfloat16)
    for w_ref, acc in zip(w_refs, acc_refs):
        acc[...] += jnp.dot(x, w_ref[...], preferred_element_type=jnp.float32)

    @pl.when(k == pl.num_programs(2) - 1)
    def _():
        for b_ref, o_ref, acc in zip(b_refs, o_refs, acc_refs):
            o_ref[...] = (acc[...] + b_ref[...]).astype(o_ref.dtype)


def multi_linear(x2d, weights, biases, out_dtype=jnp.bfloat16):
    """Compute [x @ W_i + b_i for i] with one kernel (x read once, tiled M/N/K)."""
    M, K = x2d.shape
    N = weights[0].shape[1]
    n_out = len(weights)
    bm = _pick_block(M, 512, 8)
    bn = _pick_block(N, 512, 128)
    bk = _pick_block(K, 512, 128)
    grid = (M // bm, N // bn, K // bk)

    in_specs = [pl.BlockSpec((bm, bk), lambda i, n, k: (i, k))]
    in_specs += [pl.BlockSpec((bk, bn), lambda i, n, k: (k, n))] * n_out
    in_specs += [pl.BlockSpec((1, bn), lambda i, n, k: (0, n))] * n_out
    out_specs = [pl.BlockSpec((bm, bn), lambda i, n, k: (i, n))] * n_out
    out_shape = [jax.ShapeDtypeStruct((M, N), out_dtype)] * n_out

    outs = pl.pallas_call(
        functools.partial(_multi_linear_kernel, n_out=n_out),
        grid=grid,
        in_specs=in_specs,
        out_specs=out_specs,
        out_shape=out_shape,
        scratch_shapes=[pltpu.VMEM((bm, bn), jnp.float32)] * n_out,
        compiler_params=pltpu.CompilerParams(
            dimension_semantics=("parallel", "parallel", "arbitrary"),
            vmem_limit_bytes=_VMEM_LIMIT),
    )(x2d, *weights, *biases)
    return outs if n_out > 1 else outs[0]


# ----------------------------------------------------------------------------
# Fused O-projection + residual add + LayerNorm   (K-tiled, f32 accumulator)
# ----------------------------------------------------------------------------

def _layernorm(y, g, b):
    mean = jnp.mean(y, axis=-1, keepdims=True)
    var = jnp.mean((y - mean) * (y - mean), axis=-1, keepdims=True)
    return (y - mean) * jax.lax.rsqrt(var + 1e-5) * g + b


def _oproj_add_ln_kernel(ctx_ref, res_ref, w_ref, b_ref, g_ref, beta_ref,
                         o_ref, acc_ref):
    k = pl.program_id(1)

    @pl.when(k == 0)
    def _():
        acc_ref[...] = jnp.zeros_like(acc_ref)

    acc_ref[...] += jnp.dot(ctx_ref[...].astype(jnp.bfloat16), w_ref[...],
                            preferred_element_type=jnp.float32)

    @pl.when(k == pl.num_programs(1) - 1)
    def _():
        y = acc_ref[...] + b_ref[...] + res_ref[...].astype(jnp.float32)
        o_ref[...] = _layernorm(y, g_ref[...], beta_ref[...]).astype(o_ref.dtype)


def oproj_add_layernorm(ctx2d, res2d, w, b, g, beta):
    M, K = ctx2d.shape
    H = w.shape[1]
    bm = _pick_block(M, 512, 8)
    bk = _pick_block(K, 512, 128)
    return pl.pallas_call(
        _oproj_add_ln_kernel,
        grid=(M // bm, K // bk),
        in_specs=[
            pl.BlockSpec((bm, bk), lambda i, k: (i, k)),
            pl.BlockSpec((bm, H), lambda i, k: (i, 0)),
            pl.BlockSpec((bk, H), lambda i, k: (k, 0)),
            pl.BlockSpec((1, H), lambda i, k: (0, 0)),
            pl.BlockSpec((1, H), lambda i, k: (0, 0)),
            pl.BlockSpec((1, H), lambda i, k: (0, 0)),
        ],
        out_specs=pl.BlockSpec((bm, H), lambda i, k: (i, 0)),
        out_shape=jax.ShapeDtypeStruct((M, H), jnp.bfloat16),
        scratch_shapes=[pltpu.VMEM((bm, H), jnp.float32)],
        compiler_params=pltpu.CompilerParams(
            dimension_semantics=("parallel", "arbitrary"),
            vmem_limit_bytes=_VMEM_LIMIT),
    )(ctx2d, res2d, w, b, g, beta)


# ----------------------------------------------------------------------------
# Fused FFN (fc1 + ReLU + fc2) + residual add + LayerNorm   (FF-tiled)
# ----------------------------------------------------------------------------

def _ffn_add_ln_kernel(x_ref, w1_ref, b1_ref, w2_ref, b2_ref, g_ref, beta_ref,
                       o_ref, acc_ref):
    f = pl.program_id(1)

    @pl.when(f == 0)
    def _():
        acc_ref[...] = jnp.zeros_like(acc_ref)

    x_bf = x_ref[...].astype(jnp.bfloat16)
    h = jnp.dot(x_bf, w1_ref[...], preferred_element_type=jnp.float32) + b1_ref[...]
    h = jnp.maximum(h, 0.0)
    acc_ref[...] += jnp.dot(h.astype(jnp.bfloat16), w2_ref[...],
                            preferred_element_type=jnp.float32)

    @pl.when(f == pl.num_programs(1) - 1)
    def _():
        y = acc_ref[...] + b2_ref[...] + x_ref[...].astype(jnp.float32)
        o_ref[...] = _layernorm(y, g_ref[...], beta_ref[...]).astype(o_ref.dtype)


def ffn_add_layernorm(x2d, w1, b1, w2, b2, g, beta):
    M, H = x2d.shape
    FF = w1.shape[1]
    bm = _pick_block(M, 512, 8)
    bf = _pick_block(FF, 512, 128)
    # TODO(synk): for very large H also tile the fc1 contraction (H) dimension.
    return pl.pallas_call(
        _ffn_add_ln_kernel,
        grid=(M // bm, FF // bf),
        in_specs=[
            pl.BlockSpec((bm, H), lambda i, f: (i, 0)),
            pl.BlockSpec((H, bf), lambda i, f: (0, f)),
            pl.BlockSpec((1, bf), lambda i, f: (0, f)),
            pl.BlockSpec((bf, H), lambda i, f: (f, 0)),
            pl.BlockSpec((1, H), lambda i, f: (0, 0)),
            pl.BlockSpec((1, H), lambda i, f: (0, 0)),
            pl.BlockSpec((1, H), lambda i, f: (0, 0)),
        ],
        out_specs=pl.BlockSpec((bm, H), lambda i, f: (i, 0)),
        out_shape=jax.ShapeDtypeStruct((M, H), jnp.bfloat16),
        scratch_shapes=[pltpu.VMEM((bm, H), jnp.float32)],
        compiler_params=pltpu.CompilerParams(
            dimension_semantics=("parallel", "arbitrary"),
            vmem_limit_bytes=_VMEM_LIMIT),
    )(x2d, w1, b1, w2, b2, g, beta)


# ----------------------------------------------------------------------------
# Multi-head attention core.
#   Inputs/outputs stay in lane-dense (B, S, H) layout; heads are split inside
#   the kernel (static lane slices on VMEM-resident values) and the context is
#   written back merged, so there is no wrapper-side transpose at all.
# ----------------------------------------------------------------------------

def _mha_kernel(q_ref, k_ref, v_ref, bias_ref, ctx_ref, *attn_refs,
                n_heads, head_dim, inv_scale, write_attn):
    q = q_ref[0].astype(jnp.bfloat16)        # (bq, H)
    k = k_ref[0].astype(jnp.bfloat16)        # (Sk, H)
    v = v_ref[0].astype(jnp.bfloat16)        # (Sk, H)
    bias = bias_ref[0]                       # (bq, Sk) or (1, Sk) additive f32

    for h in range(n_heads):
        sl = slice(h * head_dim, (h + 1) * head_dim)
        qh = q[:, sl]                        # (bq, hd)
        kh = k[:, sl]                        # (Sk, hd)
        vh = v[:, sl]                        # (Sk, hd)
        energy = jax.lax.dot_general(        # q @ k^T without materialized transpose
            qh, kh, (((1,), (1,)), ((), ())),
            preferred_element_type=jnp.float32) * inv_scale + bias
        m = jnp.max(energy, axis=-1, keepdims=True)
        e = jnp.exp(energy - m)
        denom = jnp.sum(e, axis=-1, keepdims=True)
        if write_attn:
            attn = e / denom                 # exact normalization (returned tensor)
            attn_refs[0][0, h] = attn
        else:
            attn = e * pl.reciprocal(denom, approx=True)   # EUP slot
        ctx_h = jnp.dot(attn.astype(jnp.bfloat16), vh,
                        preferred_element_type=jnp.float32)
        ctx_ref[0, :, sl] = ctx_h.astype(ctx_ref.dtype)


def mha(q, k, v, bias, *, n_heads, return_attn):
    """q: (B, Sq, H), k/v: (B, Sk, H), bias: (B, Qm, Sk) additive, Qm in {1, Sq}."""
    B, Sq, H = q.shape
    Sk = k.shape[1]
    Qm = bias.shape[1]
    hd = H // n_heads
    bq = _pick_block(Sq, 256, 8)
    grid = (B, Sq // bq)

    # TODO(synk): for long Sk switch to a flash-style online-softmax with an Sk
    # ("arbitrary") grid axis + m/l/acc VMEM scratch; full (bq, Sk) scores are
    # fine at these lengths and are required anyway for the returned attention.
    if Qm == 1:
        bias_spec = pl.BlockSpec((1, 1, Sk), lambda b, qb: (b, 0, 0))
    else:
        bias_spec = pl.BlockSpec((1, bq, Sk), lambda b, qb: (b, qb, 0))

    in_specs = [
        pl.BlockSpec((1, bq, H), lambda b, qb: (b, qb, 0)),
        pl.BlockSpec((1, Sk, H), lambda b, qb: (b, 0, 0)),
        pl.BlockSpec((1, Sk, H), lambda b, qb: (b, 0, 0)),
        bias_spec,
    ]
    out_shape = [jax.ShapeDtypeStruct((B, Sq, H), jnp.bfloat16)]
    out_specs = [pl.BlockSpec((1, bq, H), lambda b, qb: (b, qb, 0))]
    if return_attn:
        out_shape.append(jax.ShapeDtypeStruct((B, n_heads, Sq, Sk), jnp.float32))
        out_specs.append(pl.BlockSpec((1, n_heads, bq, Sk),
                                      lambda b, qb: (b, 0, qb, 0)))

    kernel = functools.partial(_mha_kernel, n_heads=n_heads, head_dim=hd,
                               inv_scale=1.0 / math.sqrt(hd),
                               write_attn=return_attn)
    outs = pl.pallas_call(
        kernel,
        grid=grid,
        in_specs=in_specs,
        out_specs=out_specs,
        out_shape=out_shape,
        compiler_params=pltpu.CompilerParams(
            dimension_semantics=("parallel", "parallel"),
            vmem_limit_bytes=_VMEM_LIMIT),
    )(q, k, v, bias)
    if return_attn:
        return outs[0], outs[1]
    return outs[0], None


# ----------------------------------------------------------------------------
# Parameter init (deterministic, synthetic; matmul weights stored in bf16)
# ----------------------------------------------------------------------------

def _dense(key, fan_in, fan_out):
    kw, kb = jax.random.split(key)
    w = (jax.random.normal(kw, (fan_in, fan_out), jnp.float32) * 0.02).astype(jnp.bfloat16)
    b = jax.random.normal(kb, (1, fan_out), jnp.float32) * 0.02
    return w, b


def _ln_params(H):
    return {"g": jnp.ones((1, H), jnp.float32), "b": jnp.zeros((1, H), jnp.float32)}


def init_decoder_params(key, output_dim, hidden_dim, n_layers, n_heads, ff_dim,
                        max_length):
    keys = jax.random.split(key, 3 + n_layers)
    fc_w, fc_b = _dense(keys[2], hidden_dim, output_dim)
    params = {
        "tok_emb": jax.random.normal(keys[0], (output_dim, hidden_dim), jnp.float32) * 0.02,
        "pos_emb": jax.random.normal(keys[1], (max_length, hidden_dim), jnp.float32) * 0.02,
        "fc_out": {"w": fc_w, "b": fc_b},
        "layers": [],
    }
    for li in range(n_layers):
        lk = jax.random.split(keys[3 + li], 10)
        wq_s, bq_s = _dense(lk[0], hidden_dim, hidden_dim)
        wk_s, bk_s = _dense(lk[1], hidden_dim, hidden_dim)
        wv_s, bv_s = _dense(lk[2], hidden_dim, hidden_dim)
        wo_s, bo_s = _dense(lk[3], hidden_dim, hidden_dim)
        wq_c, bq_c = _dense(lk[4], hidden_dim, hidden_dim)
        wk_c, bk_c = _dense(lk[5], hidden_dim, hidden_dim)
        wv_c, bv_c = _dense(lk[6], hidden_dim, hidden_dim)
        wo_c, bo_c = _dense(lk[7], hidden_dim, hidden_dim)
        w1, b1 = _dense(lk[8], hidden_dim, ff_dim)
        w2, b2 = _dense(lk[9], ff_dim, hidden_dim)
        params["layers"].append({
            "self_attn": {"wq": wq_s, "bq": bq_s, "wk": wk_s, "bk": bk_s,
                          "wv": wv_s, "bv": bv_s, "wo": wo_s, "bo": bo_s},
            "enc_attn": {"wq": wq_c, "bq": bq_c, "wk": wk_c, "bk": bk_c,
                         "wv": wv_c, "bv": bv_c, "wo": wo_c, "bo": bo_c},
            "ff": {"w1": w1, "b1": b1, "w2": w2, "b2": b2},
            "ln1": _ln_params(hidden_dim),
            "ln2": _ln_params(hidden_dim),
            "ln3": _ln_params(hidden_dim),
        })
    return params


# ----------------------------------------------------------------------------
# Decoder forward (mirrors PyTorch Decoder.forward; dropout = identity)
# ----------------------------------------------------------------------------

def _mask_to_bias(mask):
    # (B, 1, Qm, Sk) -> additive bias (B, Qm, Sk); padding masks stay a (B,1,Sk) row.
    m = jnp.asarray(mask)
    m = m.reshape(m.shape[0], m.shape[-2], m.shape[-1])
    return jnp.where(m == 0, jnp.float32(-1e10), jnp.float32(0.0))


def decoder_forward(params, target_ids, encoded_source, target_mask, source_mask,
                    *, n_heads):
    B, St = target_ids.shape
    H = params["tok_emb"].shape[1]
    Ss = encoded_source.shape[1]

    # Additive mask biases, computed ONCE per forward call.
    tgt_bias = _mask_to_bias(target_mask)        # (B, St, St)
    src_bias = _mask_to_bias(source_mask)        # (B, 1, Ss)

    # Embedding gather + scale + positional add: plain JAX (XLA fuses for free).
    tok = jnp.take(params["tok_emb"], target_ids, axis=0)      # (B, St, H)
    pos = jnp.take(params["pos_emb"], jnp.arange(St), axis=0)  # (St, H)
    x2d = (tok * math.sqrt(H) + pos[None, :, :]).astype(jnp.bfloat16).reshape(B * St, H)

    enc2d = encoded_source.astype(jnp.bfloat16).reshape(B * Ss, H)

    n_layers = len(params["layers"])
    attention = None
    for li, layer in enumerate(params["layers"]):
        # --- self attention + residual + LayerNorm ---
        sa = layer["self_attn"]
        q, k_, v_ = multi_linear(x2d,
                                 [sa["wq"], sa["wk"], sa["wv"]],
                                 [sa["bq"], sa["bk"], sa["bv"]])
        ctx, _ = mha(q.reshape(B, St, H), k_.reshape(B, St, H), v_.reshape(B, St, H),
                     tgt_bias, n_heads=n_heads, return_attn=False)
        x2d = oproj_add_layernorm(ctx.reshape(B * St, H), x2d, sa["wo"], sa["bo"],
                                  layer["ln1"]["g"], layer["ln1"]["b"])

        # --- encoder (cross) attention + residual + LayerNorm ---
        ea = layer["enc_attn"]
        q = multi_linear(x2d, [ea["wq"]], [ea["bq"]])
        k_, v_ = multi_linear(enc2d, [ea["wk"], ea["wv"]], [ea["bk"], ea["bv"]])
        want_attn = (li == n_layers - 1)   # only the final layer's attention is returned
        ctx, attn = mha(q.reshape(B, St, H), k_.reshape(B, Ss, H), v_.reshape(B, Ss, H),
                        src_bias, n_heads=n_heads, return_attn=want_attn)
        if attn is not None:
            attention = attn
        x2d = oproj_add_layernorm(ctx.reshape(B * St, H), x2d, ea["wo"], ea["bo"],
                                  layer["ln2"]["g"], layer["ln2"]["b"])

        # --- position-wise FFN + residual + LayerNorm ---
        ff = layer["ff"]
        x2d = ffn_add_layernorm(x2d, ff["w1"], ff["b1"], ff["w2"], ff["b2"],
                                layer["ln3"]["g"], layer["ln3"]["b"])

    logits = multi_linear(x2d, [params["fc_out"]["w"]], [params["fc_out"]["b"]],
                          out_dtype=jnp.float32)
    output_dim = params["fc_out"]["w"].shape[1]
    return logits.reshape(B, St, output_dim), attention


# ----------------------------------------------------------------------------
# Main
# ----------------------------------------------------------------------------

if __name__ == "__main__":
    # small, decoder-consistent shapes
    B = 2            # batch
    St = 8           # target sequence length
    Ss = 10          # source sequence length
    H = 32           # hidden_dim
    N_HEADS = 4
    FF = 64          # ff_dim
    N_LAYERS = 2
    VOCAB = 16       # output_dim
    MAX_LEN = 100

    key = jax.random.PRNGKey(0)
    kp, kt, ke = jax.random.split(key, 3)

    params = init_decoder_params(kp, VOCAB, H, N_LAYERS, N_HEADS, FF, MAX_LEN)

    target_ids = jax.random.randint(kt, (B, St), 0, VOCAB, dtype=jnp.int32)
    encoded_source = jax.random.normal(ke, (B, Ss, H), jnp.float32)

    # causal target mask (B, 1, St, St); full source mask (B, 1, 1, Ss)
    target_mask = jnp.tril(jnp.ones((St, St), jnp.float32))[None, None]
    target_mask = jnp.broadcast_to(target_mask, (B, 1, St, St))
    source_mask = jnp.ones((B, 1, 1, Ss), jnp.float32)

    output, attention = decoder_forward(params, target_ids, encoded_source,
                                        target_mask, source_mask,
                                        n_heads=N_HEADS)
    jax.block_until_ready((output, attention))

    assert output.shape == (B, St, VOCAB)
    assert attention.shape == (B, N_HEADS, St, Ss)
    assert bool(jnp.all(jnp.isfinite(output)))
    print("KERNEL_OK")
</pallas_src>

<mosaic_0001>
module attributes {stable_mosaic.version = 11 : i64} {
  func.func @_multi_linear_kernel(%arg0: i32, %arg1: i32, %arg2: i32, %arg3: memref<16x32xbf16, #tpu.memory_space<vmem>>, %arg4: memref<32x32xbf16, #tpu.memory_space<vmem>>, %arg5: memref<32x32xbf16, #tpu.memory_space<vmem>>, %arg6: memref<32x32xbf16, #tpu.memory_space<vmem>>, %arg7: memref<1x32xf32, #tpu.memory_space<vmem>>, %arg8: memref<1x32xf32, #tpu.memory_space<vmem>>, %arg9: memref<1x32xf32, #tpu.memory_space<vmem>>, %arg10: memref<16x32xbf16, #tpu.memory_space<vmem>>, %arg11: memref<16x32xbf16, #tpu.memory_space<vmem>>, %arg12: memref<16x32xbf16, #tpu.memory_space<vmem>>, %arg13: memref<16x32xf32, #tpu.memory_space<vmem>>, %arg14: memref<16x32xf32, #tpu.memory_space<vmem>>, %arg15: memref<16x32xf32, #tpu.memory_space<vmem>>) attributes {dimension_semantics = [#tpu.dimension_semantics<parallel>, #tpu.dimension_semantics<parallel>, #tpu.dimension_semantics<arbitrary>], iteration_bounds = array<i64: 1, 1, 1>, scalar_prefetch = 0 : i64, scratch_operands = 3 : i64, tpu.core_type = #tpu.core_type<tc>, window_params = [{transform_indices = @transform_0, window_bounds = array<i64: 16, 32>}, {transform_indices = @transform_1, window_bounds = array<i64: 32, 32>}, {transform_indices = @transform_2, window_bounds = array<i64: 32, 32>}, {transform_indices = @transform_3, window_bounds = array<i64: 32, 32>}, {transform_indices = @transform_4, window_bounds = array<i64: 1, 32>}, {transform_indices = @transform_5, window_bounds = array<i64: 1, 32>}, {transform_indices = @transform_6, window_bounds = array<i64: 1, 32>}, {transform_indices = @transform_7, window_bounds = array<i64: 16, 32>}, {transform_indices = @transform_8, window_bounds = array<i64: 16, 32>}, {transform_indices = @transform_9, window_bounds = array<i64: 16, 32>}]} {
    %c0_i32 = arith.constant 0 : i32
    %0 = arith.cmpi eq, %arg2, %c0_i32 : i32
    %1 = arith.extui %0 : i1 to i32
    %c0_i32_0 = arith.constant 0 : i32
    %2 = arith.cmpi ne, %1, %c0_i32_0 : i32
    scf.if %2 {
      %cst_24 = arith.constant 0.000000e+00 : f32
      %22 = vector.broadcast %cst_24 : f32 to vector<16x32xf32>
      %c0_25 = arith.constant 0 : index
      %c0_26 = arith.constant 0 : index
      %23 = vector.load %arg13[%c0_25, %c0_26] : memref<16x32xf32, #tpu.memory_space<vmem>>, vector<16x32xf32>
      tpu.vector_store %arg13[%c0_25, %c0_26], %22 {strides = array<i32>} : memref<16x32xf32, #tpu.memory_space<vmem>>, vector<16x32xf32>,
      %cst_27 = arith.constant 0.000000e+00 : f32
      %24 = vector.broadcast %cst_27 : f32 to vector<16x32xf32>
      %c0_28 = arith.constant 0 : index
      %c0_29 = arith.constant 0 : index
      %25 = vector.load %arg14[%c0_28, %c0_29] : memref<16x32xf32, #tpu.memory_space<vmem>>, vector<16x32xf32>
      tpu.vector_store %arg14[%c0_28, %c0_29], %24 {strides = array<i32>} : memref<16x32xf32, #tpu.memory_space<vmem>>, vector<16x32xf32>,
      %cst_30 = arith.constant 0.000000e+00 : f32
      %26 = vector.broadcast %cst_30 : f32 to vector<16x32xf32>
      %c0_31 = arith.constant 0 : index
      %c0_32 = arith.constant 0 : index
      %27 = vector.load %arg15[%c0_31, %c0_32] : memref<16x32xf32, #tpu.memory_space<vmem>>, vector<16x32xf32>
      tpu.vector_store %arg15[%c0_31, %c0_32], %26 {strides = array<i32>} : memref<16x32xf32, #tpu.memory_space<vmem>>, vector<16x32xf32>,
    } else {
    }
    %c0 = arith.constant 0 : index
    %c0_1 = arith.constant 0 : index
    %3 = vector.load %arg3[%c0, %c0_1] : memref<16x32xbf16, #tpu.memory_space<vmem>>, vector<16x32xbf16>
    %c0_2 = arith.constant 0 : index
    %c0_3 = arith.constant 0 : index
    %4 = vector.load %arg13[%c0_2, %c0_3] : memref<16x32xf32, #tpu.memory_space<vmem>>, vector<16x32xf32>
    %c0_4 = arith.constant 0 : index
    %c0_5 = arith.constant 0 : index
    %5 = vector.load %arg4[%c0_4, %c0_5] : memref<32x32xbf16, #tpu.memory_space<vmem>>, vector<32x32xbf16>
    %cst = arith.constant dense<0.000000e+00> : vector<16x32xf32>
    %6 = tpu.matmul %3, %5, %cst {dimension_numbers = #tpu.dot_dimension_numbers<[1], [0], [0], [1], [0, 0, 1, 1], [], []>} : vector<16x32xbf16>, vector<32x32xbf16>, vector<16x32xf32> -> vector<16x32xf32>
    %7 = arith.addf %4, %6 : vector<16x32xf32>
    %c0_6 = arith.constant 0 : index
    %c0_7 = arith.constant 0 : index
    %8 = vector.load %arg13[%c0_6, %c0_7] : memref<16x32xf32, #tpu.memory_space<vmem>>, vector<16x32xf32>
    tpu.vector_store %arg13[%c0_6, %c0_7], %7 {strides = array<i32>} : memref<16x32xf32, #tpu.memory_space<vmem>>, vector<16x32xf32>,
    %c0_8 = arith.constant 0 : index
    %c0_9 = arith.constant 0 : index
    %9 = vector.load %arg14[%c0_8, %c0_9] : memref<16x32xf32, #tpu.memory_space<vmem>>, vector<16x32xf32>
    %c0_10 = arith.constant 0 : index
    %c0_11 = arith.constant 0 : index
    %10 = vector.load %arg5[%c0_10, %c0_11] : memref<32x32xbf16, #tpu.memory_space<vmem>>, vector<32x32xbf16>
    %cst_12 = arith.constant dense<0.000000e+00> : vector<16x32xf32>
    %11 = tpu.matmul %3, %10, %cst_12 {dimension_numbers = #tpu.dot_dimension_numbers<[1], [0], [0], [1], [0, 0, 1, 1], [], []>} : vector<16x32xbf16>, vector<32x32xbf16>, vector<16x32xf32> -> vector<16x32xf32>
    %12 = arith.addf %9, %11 : vector<16x32xf32>
    %c0_13 = arith.constant 0 : index
    %c0_14 = arith.constant 0 : index
    %13 = vector.load %arg14[%c0_13, %c0_14] : memref<16x32xf32, #tpu.memory_space<vmem>>, vector<16x32xf32>
    tpu.vector_store %arg14[%c0_13, %c0_14], %12 {strides = array<i32>} : memref<16x32xf32, #tpu.memory_space<vmem>>, vector<16x32xf32>,
    %c0_15 = arith.constant 0 : index
    %c0_16 = arith.constant 0 : index
    %14 = vector.load %arg15[%c0_15, %c0_16] : memref<16x32xf32, #tpu.memory_space<vmem>>, vector<16x32xf32>
    %c0_17 = arith.constant 0 : index
    %c0_18 = arith.constant 0 : index
    %15 = vector.load %arg6[%c0_17, %c0_18] : memref<32x32xbf16, #tpu.memory_space<vmem>>, vector<32x32xbf16>
    %cst_19 = arith.constant dense<0.000000e+00> : vector<16x32xf32>
    %16 = tpu.matmul %3, %15, %cst_19 {dimension_numbers = #tpu.dot_dimension_numbers<[1], [0], [0], [1], [0, 0, 1, 1], [], []>} : vector<16x32xbf16>, vector<32x32xbf16>, vector<16x32xf32> -> vector<16x32xf32>
    %17 = arith.addf %14, %16 : vector<16x32xf32>
    %c0_20 = arith.constant 0 : index
    %c0_21 = arith.constant 0 : index
    %18 = vector.load %arg15[%c0_20, %c0_21] : memref<16x32xf32, #tpu.memory_space<vmem>>, vector<16x32xf32>
    tpu.vector_store %arg15[%c0_20, %c0_21], %17 {strides = array<i32>} : memref<16x32xf32, #tpu.memory_space<vmem>>, vector<16x32xf32>,
    %c0_i32_22 = arith.constant 0 : i32
    %19 = arith.cmpi eq, %arg2, %c0_i32_22 : i32
    %20 = arith.extui %19 : i1 to i32
    %c0_i32_23 = arith.constant 0 : i32
    %21 = arith.cmpi ne, %20, %c0_i32_23 : i32
    scf.if %21 {
      %c0_24 = arith.constant 0 : index
      %c0_25 = arith.constant 0 : index
      %22 = vector.load %arg13[%c0_24, %c0_25] : memref<16x32xf32, #tpu.memory_space<vmem>>, vector<16x32xf32>
      %c0_26 = arith.constant 0 : index
      %c0_27 = arith.constant 0 : index
      %23 = vector.load %arg7[%c0_26, %c0_27] : memref<1x32xf32, #tpu.memory_space<vmem>>, vector<1x32xf32>
      %24 = vector.broadcast %23 : vector<1x32xf32> to vector<16x32xf32>
      %25 = arith.addf %22, %24 : vector<16x32xf32>
      %26 = arith.truncf %25 : vector<16x32xf32> to vector<16x32xbf16>
      %c0_28 = arith.constant 0 : index
      %c0_29 = arith.constant 0 : index
      %27 = vector.load %arg10[%c0_28, %c0_29] : memref<16x32xbf16, #tpu.memory_space<vmem>>, vector<16x32xbf16>
      tpu.vector_store %arg10[%c0_28, %c0_29], %26 {strides = array<i32>} : memref<16x32xbf16, #tpu.memory_space<vmem>>, vector<16x32xbf16>,
      %c0_30 = arith.constant 0 : index
      %c0_31 = arith.constant 0 : index
      %28 = vector.load %arg14[%c0_30, %c0_31] : memref<16x32xf32, #tpu.memory_space<vmem>>, vector<16x32xf32>
      %c0_32 = arith.constant 0 : index
      %c0_33 = arith.constant 0 : index
      %29 = vector.load %arg8[%c0_32, %c0_33] : memref<1x32xf32, #tpu.memory_space<vmem>>, vector<1x32xf32>
      %30 = vector.broadcast %29 : vector<1x32xf32> to vector<16x32xf32>
      %31 = arith.addf %28, %30 : vector<16x32xf32>
      %32 = arith.truncf %31 : vector<16x32xf32> to vector<16x32xbf16>
      %c0_34 = arith.constant 0 : index
      %c0_35 = arith.constant 0 : index
      %33 = vector.load %arg11[%c0_34, %c0_35] : memref<16x32xbf16, #tpu.memory_space<vmem>>, vector<16x32xbf16>
      tpu.vector_store %arg11[%c0_34, %c0_35], %32 {strides = array<i32>} : memref<16x32xbf16, #tpu.memory_space<vmem>>, vector<16x32xbf16>,
      %c0_36 = arith.constant 0 : index
      %c0_37 = arith.constant 0 : index
      %34 = vector.load %arg15[%c0_36, %c0_37] : memref<16x32xf32, #tpu.memory_space<vmem>>, vector<16x32xf32>
      %c0_38 = arith.constant 0 : index
      %c0_39 = arith.constant 0 : index
      %35 = vector.load %arg9[%c0_38, %c0_39] : memref<1x32xf32, #tpu.memory_space<vmem>>, vector<1x32xf32>
      %36 = vector.broadcast %35 : vector<1x32xf32> to vector<16x32xf32>
      %37 = arith.addf %34, %36 : vector<16x32xf32>
      %38 = arith.truncf %37 : vector<16x32xf32> to vector<16x32xbf16>
      %c0_40 = arith.constant 0 : index
      %c0_41 = arith.constant 0 : index
      %39 = vector.load %arg12[%c0_40, %c0_41] : memref<16x32xbf16, #tpu.memory_space<vmem>>, vector<16x32xbf16>
      tpu.vector_store %arg12[%c0_40, %c0_41], %38 {strides = array<i32>} : memref<16x32xbf16, #tpu.memory_space<vmem>>, vector<16x32xbf16>,
    } else {
    }
    return
  }
  func.func @transform_0(%arg0: i32, %arg1: i32, %arg2: i32) -> (i32, i32) {
    %c0_i32 = arith.constant 0 : i32
    return %arg0, %arg2 : i32, i32
  }
  func.func @transform_1(%arg0: i32, %arg1: i32, %arg2: i32) -> (i32, i32) {
    %c0_i32 = arith.constant 0 : i32
    return %arg2, %arg1 : i32, i32
  }
  func.func @transform_2(%arg0: i32, %arg1: i32, %arg2: i32) -> (i32, i32) {
    %c0_i32 = arith.constant 0 : i32
    return %arg2, %arg1 : i32, i32
  }
  func.func @transform_3(%arg0: i32, %arg1: i32, %arg2: i32) -> (i32, i32) {
    %c0_i32 = arith.constant 0 : i32
    return %arg2, %arg1 : i32, i32
  }
  func.func @transform_4(%arg0: i32, %arg1: i32, %arg2: i32) -> (i32, i32) {
    %c0_i32 = arith.constant 0 : i32
    %c0_i32_0 = arith.constant 0 : i32
    return %c0_i32, %arg1 : i32, i32
  }
  func.func @transform_5(%arg0: i32, %arg1: i32, %arg2: i32) -> (i32, i32) {
    %c0_i32 = arith.constant 0 : i32
    %c0_i32_0 = arith.constant 0 : i32
    return %c0_i32, %arg1 : i32, i32
  }
  func.func @transform_6(%arg0: i32, %arg1: i32, %arg2: i32) -> (i32, i32) {
    %c0_i32 = arith.constant 0 : i32
    %c0_i32_0 = arith.constant 0 : i32
    return %c0_i32, %arg1 : i32, i32
  }
  func.func @transform_7(%arg0: i32, %arg1: i32, %arg2: i32) -> (i32, i32) {
    %c0_i32 = arith.constant 0 : i32
    return %arg0, %arg1 : i32, i32
  }
  func.func @transform_8(%arg0: i32, %arg1: i32, %arg2: i32) -> (i32, i32) {
    %c0_i32 = arith.constant 0 : i32
    return %arg0, %arg1 : i32, i32
  }
  func.func @transform_9(%arg0: i32, %arg1: i32, %arg2: i32) -> (i32, i32) {
    %c0_i32 = arith.constant 0 : i32
    return %arg0, %arg1 : i32, i32
  }
}

</mosaic_0001>

<bundles_post_ra>
// kernel: tpu_custom_call.1
= control target key start
LH: loop header
LB: loop body
LE: loop exit
PB: predicated region body
PF: predicated region fallthrough
CT: control target
= control target key end

     0   :  { %15 = vsyncpa [#allocation6], 0  ;;  %s777_s0 = inlined_call_operand.hbm [shape: bf16[16,32], index: 0, kind: input, shape index: {}]   ;;  %s778_s1 = inlined_call_operand.hbm [shape: bf16[32,32], index: 1, kind: input, shape index: {}]   ;;  %s779_s2 = inlined_call_operand.hbm [shape: bf16[32,32], index: 2, kind: input, shape index: {}]   ;;  %s780_s3 = inlined_call_operand.hbm [shape: bf16[32,32], index: 3, kind: input, shape index: {}]   ;;  %s781_s4 = inlined_call_operand.vmem [shape: f32[1,32], index: 4, kind: input, shape index: {}]   ;;  %s782_s5 = inlined_call_operand.vmem [shape: f32[1,32], index: 5, kind: input, shape index: {}]   ;;  %s783_s6 = inlined_call_operand.vmem [shape: f32[1,32], index: 6, kind: input, shape index: {}]   ;;  %s784_s7 = inlined_call_operand.hbm [shape: bf16[16,32], index: 7, kind: output, shape index: {0}]   ;;  %s785_s8 = inlined_call_operand.hbm [shape: bf16[16,32], index: 8, kind: output, shape index: {1}]   ;;  %s786_s9 = inlined_call_operand.hbm [shape: bf16[16,32], index: 9, kind: output, shape index: {2}]  }
   0x1   :  { %16 = vsyncpa [#allocation9], 0 }
   0x2   :  { %17 = vsyncpa [#allocation12], 0 }
   0x3   :  { %18 = vsyncpa [#allocation7], 0 }
   0x4   :  { %19 = vsyncpa [#allocation15], 0  ;;  %s641_s30 = smov [#allocation8]   ;;  %s642_s11 = smov [#allocation5]  }
   0x5   :  { %s37_s10 = sshll.u32 %s641_s30, 4  ;;  %s25_s12 = sshll.u32 %s642_s11, 4  ;;  %s38_s10 = int_to_ptr.vmem [resolvable:$true] %s37_s10  ;;  %s26_s12 = int_to_ptr.vmem [resolvable:$true] %s25_s12 }
   0x6   :  { %s499_s13 = scalar_lea.vmem %s38_s10, 256  ;;  %p504_p1 = scmp.lt.s32.totalorder %s38_s10, %s38_s10 }
   0x7   :  { %p500_p0 = scmp.ne.s32.totalorder %s38_s10, %s499_s13  ;;  %p505_p2 = scmp.lt.s32.totalorder %s499_s13, %s499_s13 }
   0x9   :  { %p506_p3 = por %p505_p2, %p504_p1 }
   0xb   :  { %p507_p4 = pnand %p506_p3, %p500_p0 }
   0xd   :  { %510 = shalt.err (!%p507_p4)
}
   0xe   :  { %s643_s14 = smov 64   ;;  %s644_s15 = smov 4  }
   0xf   :  { %43 = dma.hbm_to_vmem [thread:$0]  %s778_s1, 256, %s38_s10, [#allocation9], %s643_s14, %s643_s14, %s644_s15  }
  0x10   :  { %s519_s18 = scalar_lea.vmem %s26_s12, 128  ;;  %p524_p6 = scmp.lt.s32.totalorder %s26_s12, %s26_s12 }
  0x11   :  { %p520_p5 = scmp.ne.s32.totalorder %s26_s12, %s519_s18  ;;  %p525_p7 = scmp.lt.s32.totalorder %s519_s18, %s519_s18 }
  0x13   :  { %p526_p8 = por %p525_p7, %p524_p6 }
  0x15   :  { %p527_p9 = pnand %p526_p8, %p520_p5 }
  0x17   :  { %530 = shalt.err (!%p527_p9)
}
  0x18   :  { %31 = dma.hbm_to_vmem [thread:$0]  %s777_s0, 128, %s26_s12, [#allocation6], %s643_s14, %s643_s14, %s644_s15  }
  0x19   :  { %s645_s21 = smov [#allocation10]   ;;  %s646_s23 = smov [#allocation11]  }
  0x1a   :  { %s49_s22 = sshll.u32 %s645_s21, 4  ;;  %s61_s24 = sshll.u32 %s646_s23, 4  ;;  %s50_s22 = int_to_ptr.vmem [resolvable:$true] %s49_s22  ;;  %s62_s24 = int_to_ptr.vmem [resolvable:$true] %s61_s24 }
  0x1b   :  { %s539_s1 = scalar_lea.vmem %s50_s22, 256  ;;  %p544_p11 = scmp.lt.s32.totalorder %s50_s22, %s50_s22 }
  0x1c   :  { %p540_p10 = scmp.ne.s32.totalorder %s50_s22, %s539_s1  ;;  %p545_p12 = scmp.lt.s32.totalorder %s539_s1, %s539_s1 }
  0x1e   :  { %p546_p13 = por %p545_p12, %p544_p11 }
  0x20   :  { %p547_p0 = pnand %p546_p13, %p540_p10 }
  0x22   :  { %550 = shalt.err (!%p547_p0)
}
  0x23   :  { %55 = dma.hbm_to_vmem [thread:$0]  %s779_s2, 256, %s50_s22, [#allocation9], %s643_s14, %s643_s14, %s644_s15  }
  0x24   :  { %s559_s0 = scalar_lea.vmem %s62_s24, 256  ;;  %p564_p2 = scmp.lt.s32.totalorder %s62_s24, %s62_s24 }
  0x25   :  { %p560_p1 = scmp.ne.s32.totalorder %s62_s24, %s559_s0  ;;  %p565_p3 = scmp.lt.s32.totalorder %s559_s0, %s559_s0 }
  0x27   :  { %p566_p4 = por %p565_p3, %p564_p2 }
  0x29   :  { %p567_p5 = pnand %p566_p4, %p560_p1 }
  0x2b   :  { %570 = shalt.err (!%p567_p5)
}
  0x2c   :  { %67 = dma.hbm_to_vmem [thread:$0]  %s780_s3, 256, %s62_s24, [#allocation12], %s643_s14, %s643_s14, %s644_s15  }
  0x2d   :  { %631 = dma.done.wait [#allocation6], 128  }
  0x2e   :  { %632 = vsyncadd [#allocation6], 4294967168 }
  0x2f   :  { %633 = dma.done.wait [#allocation9], 512  }
  0x30   :  { %634 = vsyncadd [#allocation9], 4294966784 }
  0x31   :  { %635 = dma.done.wait [#allocation12], 256  }
  0x32   :  { %636 = vsyncadd [#allocation12], 4294967040  ;;  %vm91_vm0 = vcmask 261120   ;;  %v647_v0 = vmov 0.0   ;;  %vm648_vm1 = vmmov 0   ;;  %v484_v1 = vld [vmem:[#allocation8 + $0x8] sm:$0xff]  }
  0x33   :  { %449 = vmatprep.subr.bf16.mxu0 %v647_v0  ;;  %457 = vmatprep.subr.bf16.mxu1 %v647_v0  ;;  %92 = vst.msk [vmem:[#allocation2] sm:$0xff] %vm91_vm0, %v647_v0  ;;  %93 = vst.msk [vmem:[#allocation2 + $0x8] sm:$0xff] %vm91_vm0, %v647_v0  ;;  %v485_v2 = vld [vmem:[#allocation10 + $0x8] sm:$0xff]   ;;  %v486_v3 = vld [vmem:[#allocation8] sm:$0xff]   ;;  %vm320_vm2 = vcmask 257024  }
  0x34   :  { %94 = vst.msk [vmem:[#allocation3] sm:$0xff] %vm91_vm0, %v647_v0  ;;  %95 = vst.msk [vmem:[#allocation3 + $0x8] sm:$0xff] %vm91_vm0, %v647_v0  ;;  %453 = vmatprep.mubr.msk.bf16.mxu0 %vm648_vm1, %v647_v0  ;;  %461 = vmatprep.mubr.msk.bf16.mxu1 %vm648_vm1, %v647_v0  ;;  %v487_v4 = vld [vmem:[#allocation10] sm:$0xff]   ;;  %v488_v5 = vld [vmem:[#allocation5] sm:$0xff]  }
  0x35   :  { %96 = vst.msk [vmem:[#allocation4] sm:$0xff] %vm91_vm0, %v647_v0  ;;  %97 = vst.msk [vmem:[#allocation4 + $0x8] sm:$0xff] %vm91_vm0, %v647_v0  ;;  %450 = vmatpush3.bf16.msra.mxu0 %v484_v1  ;;  %458 = vmatpush3.bf16.msra.mxu1 %v485_v2  ;;  %v489_v6 = vld [vmem:[#allocation11 + $0x8] sm:$0xff]   ;;  %v490_v7 = vld [vmem:[#allocation11] sm:$0xff]  }
  0x36   :  { %451 = vmatprep.subr.bf16.mxu0 %v647_v0  ;;  %459 = vmatprep.subr.bf16.mxu1 %v647_v0  ;;  %v425_v26 = vld [vmem:[%s781_s4] ss:$0 sm:$0xff]  ;;  %s649_s4 = smov [#allocation13]  }
  0x37   :  { %v428_v28 = vld [vmem:[%s782_s5] ss:$0 sm:$0xff]  ;;  %s370_s10 = sshll.u32 %s649_s4, 4  ;;  %s650_s5 = smov [#allocation14]   ;;  %s371_s10 = int_to_ptr.vmem [resolvable:$true] %s370_s10 }
  0x38   :  { %s382_s11 = sshll.u32 %s650_s5, 4  ;;  %v431_v44 = vld [vmem:[%s783_s6] ss:$0 sm:$0xff]  ;;  %s571_s16 = scalar_lea.vmem %s371_s10, 128  ;;  %s383_s11 = int_to_ptr.vmem [resolvable:$true] %s382_s11 }
  0x39   :  { %452 = vmatpush3.bf16.msra.mxu0 %v486_v3  ;;  %460 = vmatpush3.bf16.msra.mxu1 %v487_v4  ;;  %p572_p6 = scmp.ne.s32.totalorder %s371_s10, %s571_s16  ;;  %p576_p7 = scmp.lt.s32.totalorder %s371_s10, %s371_s10 }
  0x3a   :  { %465 = vmatprep.subr.bf16.mxu0 %v647_v0  ;;  %v100_v8 = vld [vmem:[#allocation2] sm:$0xff]  ;;  %v101_v15 = vld [vmem:[#allocation2 + $0x8] sm:$0xff]  ;;  %p577_p8 = scmp.lt.s32.totalorder %s571_s16, %s571_s16 }
  0x3b   :  { %v172_v9 = vld [vmem:[#allocation3] sm:$0xff]  ;;  %v173_v17 = vld [vmem:[#allocation3 + $0x8] sm:$0xff] }
  0x3c   :  { %454 = vmatmul.mubr.msk.bf16.vlgmr.msra.gmra.mxu0 %vm91_vm0, %v488_v5  ;;  %462 = vmatmul.mubr.msk.bf16.vlgmr.msra.gmra.mxu1 %vm91_vm0, %v488_v5  ;;  %v235_v23 = vld [vmem:[#allocation4] sm:$0xff]  ;;  %v236_v30 = vld [vmem:[#allocation4 + $0x8] sm:$0xff]  ;;  %p578_p9 = por %p577_p8, %p576_p7 }
  0x3d   :  { %466 = vmatpush3.bf16.msra.mxu0 %v489_v6  ;;  %469 = vmatprep.mubr.msk.bf16.mxu0 %vm648_vm1, %v647_v0 }
  0x3e   :  { %467 = vmatprep.subr.bf16.mxu0 %v647_v0  ;;  %p579_p10 = pnand %p578_p9, %p572_p6 }
  0x41   :  { %468 = vmatpush3.bf16.msra.mxu0 %v490_v7 }
  0x44   :  { %470 = vmatmul.mubr.msk.bf16.vlgmr.msra.gmra.mxu0 %vm91_vm0, %v488_v5 }
  0xfc   :  { %v161_v10 = vpop.f32.mrf.mxu0  ;;  %v224_v12 = vpop.f32.mrf.mxu1 }
  0xfd   :  { %v168_v11 = vadd.f32 %v161_v10, %v100_v8  ;;  %v231_v14 = vadd.f32 %v224_v12, %v172_v9 }
  0xfe   :  { %v455_v13 = vpop.f32.mrf.mxu0  ;;  %v463_v16 = vpop.f32.mrf.mxu1 }
  0xff   :  { %170 = vst.msk [vmem:[#allocation2] sm:$0xff] %vm91_vm0, %v168_v11  ;;  %233 = vst.msk [vmem:[#allocation3] sm:$0xff] %vm91_vm0, %v231_v14 }
 0x100   :  { %v164_v18 = vpop.f32.mrf.mxu0  ;;  %v227_v20 = vpop.f32.mrf.mxu1 }
 0x101   :  { %v169_v19 = vadd.f32 %v164_v18, %v101_v15  ;;  %v232_v22 = vadd.f32 %v227_v20, %v173_v17 }
 0x102   :  { %v456_v21 = vpop.f32.mrf.mxu0  ;;  %v464_v24 = vpop.f32.mrf.mxu1 }
 0x103   :  { %171 = vst.msk [vmem:[#allocation2 + $0x8] sm:$0xff] %vm91_vm0, %v169_v19  ;;  %234 = vst.msk [vmem:[#allocation3 + $0x8] sm:$0xff] %vm91_vm0, %v232_v22 }
 0x104   :  { %v287_v25 = vpop.f32.mrf.mxu0 }
 0x105   :  { %v294_v27 = vadd.f32 %v287_v25, %v235_v23 }
 0x106   :  { %v471_v29 = vpop.f32.mrf.mxu0  ;;  %v301_v31 = vld [vmem:[#allocation2] sm:$0xff]  ;;  %v323_v32 = vld [vmem:[#allocation3] sm:$0xff] }
 0x107   :  { %296 = vst.msk [vmem:[#allocation4] sm:$0xff] %vm91_vm0, %v294_v27  ;;  %v310_v33 = vadd.f32 %v425_v26, %v301_v31  ;;  %v332_v35 = vadd.f32 %v428_v28, %v323_v32 }
 0x108   :  { %v290_v34 = vpop.f32.mrf.mxu0 }
 0x109   :  { %v295_v36 = vadd.f32 %v290_v34, %v236_v30  ;;  %v434_v37 = vpack.c.bf16 %v310_v33, %v310_v33  ;;  %v436_v39 = vpack.c.bf16 %v332_v35, %v332_v35 }
 0x10a   :  { %v472_v38 = vpop.f32.mrf.mxu0  ;;  %v302_v40 = vld [vmem:[#allocation2 + $0x8] sm:$0xff]  ;;  %v324_v41 = vld [vmem:[#allocation3 + $0x8] sm:$0xff] }
 0x10b   :  { %297 = vst.msk [vmem:[#allocation4 + $0x8] sm:$0xff] %vm91_vm0, %v295_v36  ;;  %v311_v42 = vadd.f32 %v425_v26, %v302_v40  ;;  %v333_v43 = vadd.f32 %v428_v28, %v324_v41 }
 0x10c   :  { %321 = vst.msk [vmem:[#allocation13] sm:$0xf] %vm320_vm2, %v434_v37  ;;  %342 = vst.msk [vmem:[#allocation14] sm:$0xf] %vm320_vm2, %v436_v39 }
 0x10d   :  { %v435_v45 = vpack.c.bf16 %v311_v42, %v311_v42  ;;  %v437_v46 = vpack.c.bf16 %v333_v43, %v333_v43 }
 0x10e   :  { %v344_v47 = vld [vmem:[#allocation4] sm:$0xff] }
 0x10f   :  { %322 = vst.msk [vmem:[#allocation13 + $0x4] sm:$0xf] %vm320_vm2, %v435_v45  ;;  %v353_v48 = vadd.f32 %v431_v44, %v344_v47  ;;  %343 = vst.msk [vmem:[#allocation14 + $0x4] sm:$0xf] %vm320_vm2, %v437_v46 }
 0x110   :  { %582 = shalt.err (!%p579_p10)
}
 0x111   :  { %376 = dma.vmem_to_hbm [thread:$0]  %s371_s10, 128, %s784_s7, [#allocation7], %s643_s14, %s643_s14, %s644_s15  }
 0x112   :  { %s591_s18 = scalar_lea.vmem %s383_s11, 128  ;;  %p596_p12 = scmp.lt.s32.totalorder %s383_s11, %s383_s11 }
 0x113   :  { %p592_p11 = scmp.ne.s32.totalorder %s383_s11, %s591_s18  ;;  %p597_p13 = scmp.lt.s32.totalorder %s591_s18, %s591_s18 }
 0x115   :  { %p598_p0 = por %p597_p13, %p596_p12 }
 0x117   :  { %p599_p1 = pnand %p598_p0, %p592_p11 }
 0x119   :  { %602 = shalt.err (!%p599_p1)
}
 0x11a   :  { %388 = dma.vmem_to_hbm [thread:$0]  %s383_s11, 128, %s785_s8, [#allocation15], %s643_s14, %s643_s14, %s644_s15   ;;  %v438_v49 = vpack.c.bf16 %v353_v48, %v353_v48  ;;  %v345_v50 = vld [vmem:[#allocation4 + $0x8] sm:$0xff] }
 0x11b   :  { %s651_s21 = smov [#allocation16]   ;;  %v354_v51 = vadd.f32 %v431_v44, %v345_v50 }
 0x11c   :  { %s394_s22 = sshll.u32 %s651_s21, 4  ;;  %363 = vst.msk [vmem:[#allocation16] sm:$0xf] %vm320_vm2, %v438_v49  ;;  %s395_s22 = int_to_ptr.vmem [resolvable:$true] %s394_s22 }
 0x11d   :  { %v439_v52 = vpack.c.bf16 %v354_v51, %v354_v51  ;;  %s611_s7 = scalar_lea.vmem %s395_s22, 128  ;;  %p616_p3 = scmp.lt.s32.totalorder %s395_s22, %s395_s22 }
 0x11e   :  { %p612_p2 = scmp.ne.s32.totalorder %s395_s22, %s611_s7  ;;  %p617_p4 = scmp.lt.s32.totalorder %s611_s7, %s611_s7 }
 0x11f   :  { %364 = vst.msk [vmem:[#allocation16 + $0x4] sm:$0xf] %vm320_vm2, %v439_v52 }
 0x120   :  { %p618_p5 = por %p617_p4, %p616_p3 }
 0x122   :  { %p619_p6 = pnand %p618_p5, %p612_p2 }
 0x124   :  { %622 = shalt.err (!%p619_p6)
}
 0x125   :  { %400 = dma.vmem_to_hbm [thread:$0]  %s395_s22, 128, %s786_s9, [#allocation15], %s643_s14, %s643_s14, %s644_s15  }
 0x126   :  { %637 = dma.done.wait [#allocation7], 128  }
 0x127   :  { %638 = vsyncadd [#allocation7], 4294967168 }
 0x128   :  { %639 = dma.done.wait [#allocation15], 256  }
 0x129   :  { %640 = vsyncadd [#allocation15], 4294967040 }
 0x12a   :  { %410 = vsyncpa [#allocation6], 1 }
 0x12b   :  { %411 = vsyncpa [#allocation9], 1 }
 0x12c   :  { %412 = vsyncpa [#allocation12], 1 }
 0x12d   :  { %413 = vsyncpa [#allocation7], 1 }
 0x12e   :  { %414 = vsyncpa [#allocation15], 1 }

</bundles_post_ra>
